<compile_context>
chip_gen: v7x
topology: tpu7x:2x2x1
jax: 0.10.0
libtpu: 0.0.40
codegen_flags: <defaults>
</compile_context>

<pallas_src>
import functools

import jax
import jax.numpy as jnp
from jax.experimental import pallas as pl
from jax.experimental.pallas import tpu as pltpu

_LANE = 128
_SUBLANE = 8


def _round_up(v, m):
    return (v + m - 1) // m * m


def _fms_kernel(x_ref, w_ref, b_ref, o_ref, *, compute_dtype):
    # x_ref: (tm, K)   w_ref: (K, Np)   b_ref: (1, Np)   o_ref: (tm, Np)
    x = x_ref[...]
    w = w_ref[...]
    if compute_dtype is not None:          # optional bf16 operands (v6e/v7x MXU)
        x = x.astype(compute_dtype)
        w = w.astype(compute_dtype)
    acc = jnp.dot(x, w, preferred_element_type=jnp.float32)
    acc = acc + b_ref[...]                 # bias broadcast over rows, f32
    o_ref[...] = jax.nn.sigmoid(acc).astype(o_ref.dtype)


def prepare_fms_params(weight, bias):
    """One-time parameter prep (outside the hot path).

    weight: (C, out_features, in_features)  -- PyTorch nn.Linear layout, stacked over layers
    bias:   (C, out_features)

    Returns (w_kn, b_1n, n_out):
      w_kn: (C, in_features, Np)  transposed + zero-padded to a lane multiple (128)
      b_1n: (C, 1, Np)            zero-padded bias
      n_out: original out_features (for slicing the padded output)
    """
    C, N, K = weight.shape
    n_pad = _round_up(max(N, 1), _LANE)
    w_kn = jnp.swapaxes(weight, 1, 2)                                  # (C, K, N)
    w_kn = jnp.pad(w_kn, ((0, 0), (0, 0), (0, n_pad - N)))             # (C, K, Np)
    b_1n = jnp.pad(bias, ((0, 0), (0, n_pad - N))).reshape(C, 1, n_pad)
    return w_kn, b_1n, N


def fused_fms_forward(x, w_kn, b_1n, n_out, *, tm=512, compute_dtype=None,
                      interpret=False):
    """sigmoid(x @ W + b) for C independent FMS layers in a single pallas_call.

    x:    (C, M, K)   per-layer inputs (batch/channel rows flattened by the caller)
    w_kn: (C, K, Np)  prepared weights (see prepare_fms_params)
    b_1n: (C, 1, Np)  prepared biases
    Returns (C, M, n_out).
    """
    C, M, K = x.shape
    _, _, Np = w_kn.shape

    if M <= tm:
        tm = M                              # single lane-dense row block per layer
    else:
        tm = _round_up(tm, _SUBLANE)        # partial last block handled by Pallas
    grid = (C, pl.cdiv(M, tm))

    # Double-buffered block footprint + headroom; cap at 64 MiB (v7x physical VMEM).
    itemsize = max(jnp.dtype(x.dtype).itemsize, 4)
    blk_bytes = (tm * K + K * Np + Np + tm * Np) * itemsize
    vmem_limit = min(max(4 * blk_bytes + (8 << 20), 16 << 20), 64 << 20)

    kernel = functools.partial(_fms_kernel, compute_dtype=compute_dtype)

    y_pad = pl.pallas_call(
        kernel,
        out_shape=jax.ShapeDtypeStruct((C, M, Np), x.dtype),
        grid_spec=pltpu.PrefetchScalarGridSpec(
            num_scalar_prefetch=0,
            grid=grid,
            in_specs=[
                pl.BlockSpec((None, tm, K), lambda c, i: (c, i, 0)),
                # Weight/bias blocks are constant along the row axis; at these sizes the
                # default double-buffering costs negligible VMEM, so we keep it
                # (pl.Buffered(1) would reclaim it if N were scaled up much further).
                pl.BlockSpec((None, K, Np), lambda c, i: (c, 0, 0)),
                pl.BlockSpec((None, 1, Np), lambda c, i: (c, 0, 0)),
            ],
            out_specs=pl.BlockSpec((None, tm, Np), lambda c, i: (c, i, 0)),
        ),
        compiler_params=pltpu.CompilerParams(
            dimension_semantics=("parallel", "parallel"),
            vmem_limit_bytes=vmem_limit,
        ),
        interpret=interpret,
    )(x, w_kn, b_1n)

    # Padded output lanes hold sigmoid(0) = 0.5 -> slice them off before use.
    return y_pad[:, :, :n_out]


def fms_forward(x, weight, bias, **kwargs):
    """Single-layer convenience wrapper (PyTorch layout: weight (out,in), bias (out,))."""
    w_kn, b_1n, n_out = prepare_fms_params(weight[None], bias[None])
    return fused_fms_forward(x[None], w_kn, b_1n, n_out, **kwargs)[0]


if __name__ == "__main__":
    # Shapes consistent with SpeakerExtractorShortGRULikeChannels(version=3):
    # n_stacked_tcnblocks FMS(time_dim, 1) layers, layer i applied to cache[i] of
    # shape (batch, n_channels, time_dim); the result gates y (broadcast over time).
    B, n_channels, time_dim = 2, 64, 32
    n_stacked = 3
    in_features, out_features = time_dim, 1

    key = jax.random.PRNGKey(0)
    kx, kw, kb, kx2, kw2, kb2 = jax.random.split(key, 6)

    # Cache tensors for each stacked block, flattened to rows -> (C, M, K).
    caches = jax.random.normal(
        kx, (n_stacked, B, n_channels, time_dim), dtype=jnp.float32)
    x = caches.reshape(n_stacked, B * n_channels, time_dim)

    bound = 1.0 / (in_features ** 0.5)
    weight = jax.random.uniform(
        kw, (n_stacked, out_features, in_features),
        minval=-bound, maxval=bound, dtype=jnp.float32)
    bias = jax.random.uniform(
        kb, (n_stacked, out_features), minval=-bound, maxval=bound, dtype=jnp.float32)

    # One-time parameter prep (transpose + lane padding) outside the per-call path.
    w_kn, b_1n, n_out = prepare_fms_params(weight, bias)

    y = fused_fms_forward(x, w_kn, b_1n, n_out)
    y = jax.block_until_ready(y)

    # Pure-JAX reference of the PyTorch FMS forward (per layer).
    y_ref = jax.nn.sigmoid(jnp.einsum("cmk,cnk->cmn", x, weight) + bias[:, None, :])
    assert y.shape == (n_stacked, B * n_channels, out_features)
    assert jnp.allclose(y, y_ref, atol=1e-5, rtol=1e-5)

    # How the module consumes it: y_block = y_block * FMS(cache[i])  (broadcast over time).
    gate = y.reshape(n_stacked, B, n_channels, 1)
    jax.block_until_ready(gate)

    # Optional bf16-operand path (v6e/v7x MXU) -- looser tolerance, f32 accumulate.
    y_bf16 = fused_fms_forward(x, w_kn, b_1n, n_out, compute_dtype=jnp.bfloat16)
    y_bf16 = jax.block_until_ready(y_bf16)
    assert jnp.allclose(y_bf16, y_ref, atol=2e-2, rtol=2e-2)

    # Generic FMS (wider out_features) still works through the same fused kernel.
    M2, K2, N2 = 16, 32, 64
    x2 = jax.random.normal(kx2, (M2, K2), dtype=jnp.float32)
    bound2 = 1.0 / (K2 ** 0.5)
    w2 = jax.random.uniform(kw2, (N2, K2), minval=-bound2, maxval=bound2,
                            dtype=jnp.float32)
    b2 = jax.random.uniform(kb2, (N2,), minval=-bound2, maxval=bound2,
                            dtype=jnp.float32)
    y2 = jax.block_until_ready(fms_forward(x2, w2, b2))
    y2_ref = jax.nn.sigmoid(x2 @ w2.T + b2)
    assert jnp.allclose(y2, y2_ref, atol=1e-5, rtol=1e-5)

    # TODO(synk): the rest of SpeakerExtractorShortGRULikeChannels (LayerNorm, 1x1
    # convs, TCN blocks, GRU-like memory update) is out of scope for this kernel.
    print("KERNEL_OK")
</pallas_src>

<mosaic_0001>
module attributes {stable_mosaic.version = 11 : i64} {
  func.func @_fms_kernel(%arg0: i32, %arg1: i32, %arg2: memref<1x128x32xf32, #tpu.memory_space<vmem>>, %arg3: memref<1x32x128xf32, #tpu.memory_space<vmem>>, %arg4: memref<1x1x128xf32, #tpu.memory_space<vmem>>, %arg5: memref<1x128x128xf32, #tpu.memory_space<vmem>>) attributes {dimension_semantics = [#tpu.dimension_semantics<parallel>, #tpu.dimension_semantics<parallel>], iteration_bounds = array<i64: 3, 1>, scalar_prefetch = 0 : i64, scratch_operands = 0 : i64, tpu.core_type = #tpu.core_type<tc>, window_params = [{transform_indices = @transform_0, window_bounds = array<i64: 1, 128, 32>}, {transform_indices = @transform_1, window_bounds = array<i64: 1, 32, 128>}, {transform_indices = @transform_2, window_bounds = array<i64: 1, 1, 128>}, {transform_indices = @transform_3, window_bounds = array<i64: 1, 128, 128>}]} {
    %c0 = arith.constant 0 : index
    %c0_0 = arith.constant 0 : index
    %c0_1 = arith.constant 0 : index
    %0 = vector.load %arg2[%c0, %c0_0, %c0_1] : memref<1x128x32xf32, #tpu.memory_space<vmem>>, vector<1x128x32xf32>
    %1 = vector.shape_cast %0 : vector<1x128x32xf32> to vector<128x32xf32>
    %c0_2 = arith.constant 0 : index
    %c0_3 = arith.constant 0 : index
    %c0_4 = arith.constant 0 : index
    %2 = vector.load %arg3[%c0_2, %c0_3, %c0_4] : memref<1x32x128xf32, #tpu.memory_space<vmem>>, vector<1x32x128xf32>
    %3 = vector.shape_cast %2 : vector<1x32x128xf32> to vector<32x128xf32>
    %cst = arith.constant dense<0.000000e+00> : vector<128x128xf32>
    %4 = tpu.matmul %1, %3, %cst {dimension_numbers = #tpu.dot_dimension_numbers<[1], [0], [0], [1], [0, 0, 1, 1], [], []>} : vector<128x32xf32>, vector<32x128xf32>, vector<128x128xf32> -> vector<128x128xf32>
    %c0_5 = arith.constant 0 : index
    %c0_6 = arith.constant 0 : index
    %c0_7 = arith.constant 0 : index
    %5 = vector.load %arg4[%c0_5, %c0_6, %c0_7] : memref<1x1x128xf32, #tpu.memory_space<vmem>>, vector<1x1x128xf32>
    %6 = vector.shape_cast %5 : vector<1x1x128xf32> to vector<1x128xf32>
    %7 = vector.broadcast %6 : vector<1x128xf32> to vector<128x128xf32>
    %8 = arith.addf %4, %7 : vector<128x128xf32>
    %9 = arith.negf %8 : vector<128x128xf32>
    %10 = math.exp %9 : vector<128x128xf32>
    %cst_8 = arith.constant 1.000000e+00 : f32
    %11 = vector.broadcast %cst_8 : f32 to vector<128x128xf32>
    %12 = arith.addf %11, %10 : vector<128x128xf32>
    %13 = arith.divf %11, %12 : vector<128x128xf32>
    %c0_9 = arith.constant 0 : index
    %c0_10 = arith.constant 0 : index
    %c0_11 = arith.constant 0 : index
    %14 = vector.load %arg5[%c0_9, %c0_10, %c0_11] : memref<1x128x128xf32, #tpu.memory_space<vmem>>, vector<1x128x128xf32>
    %15 = vector.shape_cast %14 : vector<1x128x128xf32> to vector<128x128xf32>
    %16 = vector.shape_cast %13 : vector<128x128xf32> to vector<1x128x128xf32>
    tpu.vector_store %arg5[%c0_9, %c0_10, %c0_11], %16 {strides = array<i32>} : memref<1x128x128xf32, #tpu.memory_space<vmem>>, vector<1x128x128xf32>,
    return
  }
  func.func @transform_0(%arg0: i32, %arg1: i32) -> (i32, i32, i32) {
    %c0_i32 = arith.constant 0 : i32
    %c0_i32_0 = arith.constant 0 : i32
    return %arg0, %arg1, %c0_i32 : i32, i32, i32
  }
  func.func @transform_1(%arg0: i32, %arg1: i32) -> (i32, i32, i32) {
    %c0_i32 = arith.constant 0 : i32
    %c0_i32_0 = arith.constant 0 : i32
    %c0_i32_1 = arith.constant 0 : i32
    return %arg0, %c0_i32, %c0_i32_0 : i32, i32, i32
  }
  func.func @transform_2(%arg0: i32, %arg1: i32) -> (i32, i32, i32) {
    %c0_i32 = arith.constant 0 : i32
    %c0_i32_0 = arith.constant 0 : i32
    %c0_i32_1 = arith.constant 0 : i32
    return %arg0, %c0_i32, %c0_i32_0 : i32, i32, i32
  }
  func.func @transform_3(%arg0: i32, %arg1: i32) -> (i32, i32, i32) {
    %c0_i32 = arith.constant 0 : i32
    %c0_i32_0 = arith.constant 0 : i32
    return %arg0, %arg1, %c0_i32 : i32, i32, i32
  }
}

</mosaic_0001>

<bundles_post_ra>
// kernel: tpu_custom_call.1
= control target key start
LH: loop header
LB: loop body
LE: loop exit
PB: predicated region body
PF: predicated region fallthrough
CT: control target
= control target key end

     0   :  { %8 = vsyncpa [#allocation3], 0  ;;  %s1205_s0 = inlined_call_operand.vmem [shape: f32[3,128,32], index: 0, kind: input, shape index: {}]   ;;  %s1206_s1 = inlined_call_operand.vmem [shape: f32[3,32,128], index: 1, kind: input, shape index: {}]   ;;  %s1207_s2 = inlined_call_operand.vmem [shape: f32[3,1,128], index: 2, kind: input, shape index: {}]   ;;  %s1208_s3 = inlined_call_operand.hbm [shape: f32[3,128,128], index: 3, kind: output, shape index: {}]  }
   0x1   :  { %10 = vsyncpa [#allocation3 + $0x1], 0  ;;  %s1022_s12 = smov 0   ;;  %s1024_s13 = smov 0  }
   0x2   :  { %s1026_s14 = smov 0   ;;  %s1028_s15 = smov 0  }
   0x3   :  { %s1030_s16 = smov 0   ;;  %s1032_s17 = smov 0  }
   0x4 LB: > { %s683_s18 = sadd.s32 4294967295, %s997_s17   ;;  %s684_s19 = sadd.s32 4294967294, %s997_s17   ;;  %s997_s17 = sphi %s1032_s17, %s16_s17   ;;  %s993_s16 = sphi %s1030_s16, %s1215_s16   ;;  %s989_s15 = sphi %s1028_s15, %s1214_s15   ;;  %s985_s14 = sphi %s1026_s14, %s1213_s14   ;;  %s981_s13 = sphi %s1024_s13, %s1212_s13   ;;  %s977_s12 = sphi %s1022_s12, %s1211_s12  }
   0x5   : > { %s28_s20 = sadd.s32 1, %s993_s16  ;;  %s117_s21 = sadd.s32 1, %s985_s14 }
   0x6   : > { %p30_p0 = scmp.ge.s32.totalorder %s28_s20, 3  ;;  %p127_p1 = scmp.ne.s32.totalorder %s985_s14, %s981_s13 }
   0x7   : > { %p128_p2 = scmp.eq.s32.totalorder %s683_s18, 2  ;;  %p133_p3 = scmp.ne.s32.totalorder %s981_s13, %s977_s12 }
   0x8   : > { %s1217_s20 = smov (%p30_p0, %s28_s20), 0  ;;  %p134_p5 = scmp.eq.s32.totalorder %s684_s19, 2 }
   0x9   : > { %p1062_p4 = por %p128_p2, %p127_p1  ;;  %s112_s23 = ssub.s32 %s993_s16, %s1217_s20 }
   0xa   : > { %p687_p6 = scmp.ge.s32.totalorder %s997_s17, 1  ;;  %p115_p7 = scmp.eq.s32.totalorder %s112_s23, 0 }
   0xb   : > { %p1069_p8 = por %p134_p5, %p133_p3  ;;  %p179_p9 = scmp.lt.s32.totalorder %s997_s17, 4 }
   0xc   : > { %s1075_s25 = scalar_select %p115_p7, %s985_s14, %s117_s21  }
   0xd   : > { %p180_p10 = pnand %p687_p6, %p179_p9 }
   0xe   : > { %p216_p11 = scmp.lt.s32.totalorder (!%p180_p10), %s989_s15, 2  ;;  %vm261_vm0 = vcmask (!%p180_p10), 261120   ;;  %s212_s11 = sand.u32 (!%p180_p10), 1, %s981_s13  }
   0xf   : > { %183 = sbr.rel (%p180_p10) target bundleno = 320 (0x140), region = 32  ;;  %s688_s18 = sshll.u32 (!%p180_p10), %s212_s11, 7 }
  0x10   : > { %s1130_s19 = scalar_lea.vmem (!%p180_p10), [#allocation2], %s688_s18  ;;  %s733_s21 = sshll.u32 (!%p180_p10), %s989_s15, 11 }
  0x11   : > { %s583_s23 = sshll.u32 (!%p180_p10), %s1130_s19, 4  ;;  %s1159_s29 = scalar_lea.sflag (!%p180_p10), [#allocation3], %s212_s11  ;;  %s1152_s23 = int_to_ptr.vmem [resolvable:$true] %s583_s23 }
  0x12   : > { %s999_s30 = smov (!%p180_p10), [#allocation2]  }
  0x16   : > { %s1079_s26 = scalar_select %p216_p11, %s989_s15, 2 }
  0x17   : > { %s919_s15 = scalar_lea.vmem %s1152_s23, 2048 }
  0x18   : > { %s731_s27 = sshll.u32 %s1079_s26, 7  ;;  %s732_s28 = sshll.u32 %s1079_s26, 5 }
  0x19   : > { %s1086_s4 = scalar_lea.vmem %s1205_s0, %s731_s27  ;;  %s229_s7 = scalar_lea.vmem %s1206_s1, %s732_s28 }
  0x1a   : > { %v250_v0 = vld [vmem:[%s229_s7] sm:$0xff]  ;;  %v251_v1 = vld [vmem:[%s229_s7 + $0x8] sm:$0xff]  ;;  %v252_v2 = vld [vmem:[%s229_s7 + $0x10] sm:$0xff]  ;;  %s232_s10 = scalar_lea.vmem %s1207_s2, %s1079_s26  ;;  %s1150_s28 = scalar_lea.hbm %s1208_s3, %s733_s21 }
  0x1b   : > { %v786_v3 = vpack.c.bf16 %v251_v1, %v250_v0  ;;  %v253_v4 = vld [vmem:[%s229_s7 + $0x18] sm:$0xff]  ;;  %v234_v5 = vld [vmem:[%s1086_s4] sm:$0xff]  ;;  %v235_v8 = vld [vmem:[%s1086_s4 + $0x8] sm:$0xff]  ;;  %p920_p12 = scmp.ne.s32.totalorder %s1152_s23, %s919_s15 }
  0x1c   : > { %v790_v6 = vpack.c.bf16 %v253_v4, %v252_v2  ;;  %762 = vmatprep.mubr.msk.f32.mxu0 %vm261_vm0, %v234_v5  ;;  %v242_v7 = vld [vmem:[%s1086_s4 + $0x40] sm:$0xff]  ;;  %v243_v9 = vld [vmem:[%s1086_s4 + $0x48] sm:$0xff]  ;;  %v236_v10 = vld [vmem:[%s1086_s4 + $0x10] sm:$0xff] }
  0x1d   : > { %787 = vmatprep.subr.bf16.mxu0 %v786_v3  ;;  %794 = vmatprep.subr.bf16.mxu1 %v786_v3  ;;  %v244_v11 = vld [vmem:[%s1086_s4 + $0x50] sm:$0xff]  ;;  %v237_v12 = vld [vmem:[%s1086_s4 + $0x18] sm:$0xff]  ;;  %v238_v14 = vld [vmem:[%s1086_s4 + $0x20] sm:$0xff]  ;;  %p921_p13 = pnand %p920_p12, %p1062_p4 }
  0x1e   : > { %789 = vmatpush3.bf16.msra.mxu0 %v786_v3  ;;  %796 = vmatpush3.bf16.msra.mxu1 %v786_v3  ;;  %v245_v13 = vld [vmem:[%s1086_s4 + $0x58] sm:$0xff]  ;;  %v246_v15 = vld [vmem:[%s1086_s4 + $0x60] sm:$0xff]  ;;  %v239_v16 = vld [vmem:[%s1086_s4 + $0x28] sm:$0xff] }
  0x1f   : > { %791 = vmatprep.subr.bf16.mxu0 %v790_v6  ;;  %795 = vmatprep.subr.bf16.mxu1 %v790_v6  ;;  %v247_v17 = vld [vmem:[%s1086_s4 + $0x68] sm:$0xff]  ;;  %v240_v18 = vld [vmem:[%s1086_s4 + $0x30] sm:$0xff]  ;;  %v241_v20 = vld [vmem:[%s1086_s4 + $0x38] sm:$0xff]  ;;  %p922_p0 = pneg %p921_p13 }
  0x20   : > { %774 = vmatprep.mubr.msk.f32.mxu1 %vm261_vm0, %v242_v7  ;;  %v248_v19 = vld [vmem:[%s1086_s4 + $0x70] sm:$0xff]  ;;  %v249_v21 = vld [vmem:[%s1086_s4 + $0x78] sm:$0xff]  ;;  %v693_v22 = vld [vmem:[%s232_s10] ss:$0 sm:$0xff]  ;;  %s923_s4 = sshll.u32 %s999_s30, 4  ;;  %s924_s4 = int_to_ptr.vmem [resolvable:$false] %s923_s4 }
  0x21   : > { %s925_s5 = scalar_lea.vmem %s924_s4, 4096  ;;  %p926_p1 = scmp.lt.s32.totalorder %s1152_s23, %s924_s4 }
  0x22   : > { %793 = vmatpush3.bf16.msra.mxu0 %v790_v6  ;;  %797 = vmatpush3.bf16.msra.mxu1 %v790_v6  ;;  %p927_p2 = scmp.lt.s32.totalorder %s925_s5, %s919_s15 }
  0x24   : > { %p928_p3 = por %p927_p2, %p926_p1 }
  0x25   : > { %763 = vmatmul.mubr.msk.f32.vlgmr.msra.gmra.mrb[0].mxu0 %vm261_vm0, %v235_v8  ;;  %775 = vmatmul.mubr.msk.f32.vlgmr.msra.gmra.mrb[0].mxu1 %vm261_vm0, %v243_v9 }
  0x26   : > { %765 = vmatprep.mubr.msk.f32.mxu0 %vm261_vm0, %v236_v10  ;;  %777 = vmatprep.mubr.msk.f32.mxu1 %vm261_vm0, %v244_v11  ;;  %p929_p5 = pnand %p928_p3, %p922_p0 }
  0x29   : > { %766 = vmatmul.mubr.msk.f32.gmra.mrb[2].mxu0 %vm261_vm0, %v237_v12  ;;  %778 = vmatmul.mubr.msk.f32.gmra.mrb[2].mxu1 %vm261_vm0, %v245_v13 }
  0x2a   : > { %768 = vmatprep.mubr.msk.f32.mxu0 %vm261_vm0, %v238_v14  ;;  %780 = vmatprep.mubr.msk.f32.mxu1 %vm261_vm0, %v246_v15 }
  0x2d   : > { %769 = vmatmul.mubr.msk.f32.gmra.mrb[4].mxu0 %vm261_vm0, %v239_v16  ;;  %781 = vmatmul.mubr.msk.f32.gmra.mrb[4].mxu1 %vm261_vm0, %v247_v17 }
  0x2e   : > { %771 = vmatprep.mubr.msk.f32.mxu0 %vm261_vm0, %v240_v18  ;;  %783 = vmatprep.mubr.msk.f32.mxu1 %vm261_vm0, %v248_v19 }
  0x31   : > { %772 = vmatmul.mubr.msk.f32.gmra.mrb[6].mxu0 %vm261_vm0, %v241_v20  ;;  %784 = vmatmul.mubr.msk.f32.gmra.mrb[6].mxu1 %vm261_vm0, %v249_v21 }
  0xf8   : > { %v764_v23 = vpop.f32.mrb[0].mxu0  ;;  %v776_v24 = vpop.f32.mrb[0].mxu1 }
  0xf9   : > { %v382_v25 = vadd.f32 %v764_v23, %v693_v22  ;;  %v422_v26 = vadd.f32 %v776_v24, %v693_v22  ;;  %v376_v27 = vpop.f32.mrb[1].mxu0  ;;  %v416_v28 = vpop.f32.mrb[1].mxu1 }
  0xfa   : > { %v377_v29 = vadd.f32 %v693_v22, %v376_v27  ;;  %v417_v30 = vadd.f32 %v693_v22, %v416_v28 }
  0xfb   : > { %v711_v31 = vmul.f32 -1.442695, %v382_v25  ;;  %v719_v32 = vmul.f32 -1.442695, %v422_v26 }
  0xfc   : > { %v710_v33 = vmul.f32 -1.442695, %v377_v29  ;;  %v718_v34 = vmul.f32 -1.442695, %v417_v30  ;;  %v767_v35 = vpop.f32.mrb[2].mxu0  ;;  %v779_v36 = vpop.f32.mrb[2].mxu1 }
  0xfd   : > { %855 = vpow2.f32 %v711_v31  ;;  %v392_v37 = vadd.f32 %v767_v35, %v693_v22  ;;  %v432_v38 = vadd.f32 %v779_v36, %v693_v22  ;;  %v386_v39 = vpop.f32.mrb[3].mxu0  ;;  %v426_v40 = vpop.f32.mrb[3].mxu1 }
  0xfe   : > { %857 = vpow2.f32 %v719_v32  ;;  %v387_v41 = vadd.f32 %v693_v22, %v386_v39  ;;  %v427_v42 = vadd.f32 %v693_v22, %v426_v40 }
  0xff   : > { %859 = vpow2.f32 %v710_v33  ;;  %v713_v43 = vmul.f32 -1.442695, %v392_v37  ;;  %v721_v44 = vmul.f32 -1.442695, %v432_v38 }
 0x100   : > { %861 = vpow2.f32 %v718_v34  ;;  %v712_v45 = vmul.f32 -1.442695, %v387_v41  ;;  %v720_v46 = vmul.f32 -1.442695, %v427_v42  ;;  %v770_v47 = vpop.f32.mrb[4].mxu0  ;;  %v782_v48 = vpop.f32.mrb[4].mxu1 }
 0x101   : > { %863 = vpow2.f32 %v713_v43  ;;  %v402_v49 = vadd.f32 %v770_v47, %v693_v22  ;;  %v442_v50 = vadd.f32 %v782_v48, %v693_v22  ;;  %v396_v51 = vpop.f32.mrb[5].mxu0  ;;  %v436_v52 = vpop.f32.mrb[5].mxu1 }
 0x102   : > { %865 = vpow2.f32 %v721_v44  ;;  %v397_v53 = vadd.f32 %v693_v22, %v396_v51  ;;  %v437_v54 = vadd.f32 %v693_v22, %v436_v52 }
 0x103   : > { %867 = vpow2.f32 %v712_v45  ;;  %v715_v55 = vmul.f32 -1.442695, %v402_v49  ;;  %v723_v56 = vmul.f32 -1.442695, %v442_v50 }
 0x104   : > { %869 = vpow2.f32 %v720_v46  ;;  %v714_v57 = vmul.f32 -1.442695, %v397_v53  ;;  %v722_v58 = vmul.f32 -1.442695, %v437_v54  ;;  %v773_v59 = vpop.f32.mrb[6].mxu0  ;;  %v785_v60 = vpop.f32.mrb[6].mxu1 }
 0x105   : > { %871 = vpow2.f32 %v715_v55  ;;  %v412_v61 = vadd.f32 %v773_v59, %v693_v22  ;;  %v452_v62 = vadd.f32 %v785_v60, %v693_v22  ;;  %v406_v63 = vpop.f32.mrb[7].mxu0  ;;  %v446_v0 = vpop.f32.mrb[7].mxu1 }
 0x106   : > { %873 = vpow2.f32 %v723_v56  ;;  %v407_v1 = vadd.f32 %v693_v22, %v406_v63  ;;  %v447_v2 = vadd.f32 %v693_v22, %v446_v0 }
 0x107   : > { %v856_v3 = vpop.eup %855  ;;  %875 = vpow2.f32 %v714_v57  ;;  %v717_v4 = vmul.f32 -1.442695, %v412_v61  ;;  %v725_v29 = vmul.f32 -1.442695, %v452_v62 }
 0x108   : > { %v858_v5 = vpop.eup %857  ;;  %v504_v6 = vadd.f32 1.0, %v856_v3  ;;  %877 = vpow2.f32 %v722_v58  ;;  %v716_v32 = vmul.f32 -1.442695, %v407_v1  ;;  %v724_v34 = vmul.f32 -1.442695, %v447_v2 }
 0x109   : > { %v860_v7 = vpop.eup %859  ;;  %v512_v8 = vadd.f32 1.0, %v858_v5  ;;  %879 = vpow2.f32 %v717_v4 }
 0x10a   : > { %v862_v9 = vpop.eup %861  ;;  %881 = vrcp.f32 %v504_v6  ;;  %v503_v10 = vadd.f32 1.0, %v860_v7 }
 0x10b   : > { %v864_v11 = vpop.eup %863  ;;  %883 = vrcp.f32 %v512_v8  ;;  %v511_v12 = vadd.f32 1.0, %v862_v9 }
 0x10c   : > { %v866_v13 = vpop.eup %865  ;;  %885 = vrcp.f32 %v503_v10  ;;  %v506_v14 = vadd.f32 1.0, %v864_v11 }
 0x10d   : > { %v868_v15 = vpop.eup %867  ;;  %887 = vrcp.f32 %v511_v12  ;;  %v514_v16 = vadd.f32 1.0, %v866_v13 }
 0x10e   : > { %v870_v17 = vpop.eup %869  ;;  %889 = vrcp.f32 %v506_v14  ;;  %v505_v18 = vadd.f32 1.0, %v868_v15 }
 0x10f   : > { %v872_v19 = vpop.eup %871  ;;  %891 = vrcp.f32 %v514_v16  ;;  %v513_v20 = vadd.f32 1.0, %v870_v17 }
 0x110   : > { %v874_v21 = vpop.eup %873  ;;  %893 = vrcp.f32 %v505_v18  ;;  %v508_v22 = vadd.f32 1.0, %v872_v19 }
 0x111   : > { %v876_v23 = vpop.eup %875  ;;  %895 = vrcp.f32 %v513_v20  ;;  %v516_v24 = vadd.f32 1.0, %v874_v21 }
 0x112   : > { %v878_v25 = vpop.eup %877  ;;  %897 = vrcp.f32 %v508_v22  ;;  %v507_v26 = vadd.f32 1.0, %v876_v23 }
 0x113   : > { %v880_v27 = vpop.eup %879  ;;  %899 = vrcp.f32 %v516_v24  ;;  %v515_v28 = vadd.f32 1.0, %v878_v25 }
 0x114   : > { %v882_v30 = vpop.eup %881  ;;  %901 = vrcp.f32 %v507_v26  ;;  %v510_v31 = vadd.f32 1.0, %v880_v27 }
 0x115   : > { %v884_v33 = vpop.eup %883  ;;  %552 = vst [vmem:[%s1130_s19 + $0x8] sm:$0xff] %v882_v30  ;;  %903 = vrcp.f32 %v515_v28 }
 0x116   : > { %v886_v35 = vpop.eup %885  ;;  %560 = vst [vmem:[%s1130_s19 + $0x48] sm:$0xff] %v884_v33  ;;  %905 = vrcp.f32 %v510_v31 }
 0x117   : > { %v888_v36 = vpop.eup %887  ;;  %551 = vst [vmem:[%s1130_s19] sm:$0xff] %v886_v35  ;;  %907 = vpow2.f32 %v725_v29 }
 0x118   : > { %v890_v37 = vpop.eup %889  ;;  %559 = vst [vmem:[%s1130_s19 + $0x40] sm:$0xff] %v888_v36  ;;  %909 = vpow2.f32 %v716_v32 }
 0x119   : > { %v892_v38 = vpop.eup %891  ;;  %554 = vst [vmem:[%s1130_s19 + $0x18] sm:$0xff] %v890_v37  ;;  %911 = vpow2.f32 %v724_v34 }
 0x11a   : > { %v894_v39 = vpop.eup %893  ;;  %562 = vst [vmem:[%s1130_s19 + $0x58] sm:$0xff] %v892_v38 }
 0x11b   : > { %v896_v40 = vpop.eup %895  ;;  %553 = vst [vmem:[%s1130_s19 + $0x10] sm:$0xff] %v894_v39 }
 0x11c   : > { %v898_v41 = vpop.eup %897  ;;  %561 = vst [vmem:[%s1130_s19 + $0x50] sm:$0xff] %v896_v40 }
 0x11d   : > { %v900_v42 = vpop.eup %899  ;;  %556 = vst [vmem:[%s1130_s19 + $0x28] sm:$0xff] %v898_v41 }
 0x11e   : > { %v902_v43 = vpop.eup %901  ;;  %564 = vst [vmem:[%s1130_s19 + $0x68] sm:$0xff] %v900_v42 }
 0x11f   : > { %v904_v44 = vpop.eup %903  ;;  %555 = vst [vmem:[%s1130_s19 + $0x20] sm:$0xff] %v902_v43 }
 0x120   : > { %v906_v45 = vpop.eup %905  ;;  %563 = vst [vmem:[%s1130_s19 + $0x60] sm:$0xff] %v904_v44 }
 0x121   : > { %v908_v46 = vpop.eup %907  ;;  %558 = vst [vmem:[%s1130_s19 + $0x38] sm:$0xff] %v906_v45 }
 0x122   : > { %v910_v47 = vpop.eup %909  ;;  %v518_v48 = vadd.f32 1.0, %v908_v46 }
 0x123   : > { %v912_v49 = vpop.eup %911  ;;  %v509_v50 = vadd.f32 1.0, %v910_v47 }
 0x124   : > { %913 = vrcp.f32 %v518_v48  ;;  %v517_v51 = vadd.f32 1.0, %v912_v49 }
 0x125   : > { %915 = vrcp.f32 %v509_v50 }
 0x126   : > { %917 = vrcp.f32 %v517_v51 }
 0x12e   : > { %v914_v52 = vpop.eup %913 }
 0x12f   : > { %v916_v53 = vpop.eup %915  ;;  %566 = vst [vmem:[%s1130_s19 + $0x78] sm:$0xff] %v914_v52 }
 0x130   : > { %v918_v54 = vpop.eup %917  ;;  %557 = vst [vmem:[%s1130_s19 + $0x30] sm:$0xff] %v916_v53 }
 0x131   : > { %565 = vst [vmem:[%s1130_s19 + $0x70] sm:$0xff] %v918_v54 }
 0x132   : > { %932 = shalt.err (!%p929_p5)
}
 0x133   : > { %s933_s6 = scalar_lea.hbm %s1150_s28, 2048  ;;  %s937_s9 = scalar_lea.hbm %s1208_s3, 6144 }
 0x134   : > { %p934_p6 = scmp.ne.s32.totalorder %s1150_s28, %s933_s6  ;;  %p938_p10 = scmp.lt.u32.totalorder %s1150_s28, %s1208_s3 }
 0x135   : > { %p939_p11 = scmp.lt.u32.totalorder %s937_s9, %s933_s6  ;;  %p941_p13 = scmp.lt.u32.totalorder %s933_s6, %s1150_s28 }
 0x136   : > { %p935_p7 = pnand %p934_p6, %p1062_p4 }
 0x137   : > { %p940_p12 = por %p939_p11, %p938_p10 }
 0x138   : > { %p936_p9 = pneg %p935_p7 }
 0x139   : > { %p942_p0 = por %p941_p13, %p940_p12 }
 0x13b   : > { %p943_p1 = pnand %p942_p0, %p936_p9 }
 0x13d   : > { %946 = shalt.err (!%p943_p1)
}
 0x13e   : > { %s1000_s18 = smov 128   ;;  %s1001_s19 = smov 8  }
 0x13f   : > { %798 = dma.vmem_to_hbm [thread:$0]  (%p1062_p4), %s1152_s23, 2048, %s1150_s28, %s1159_s29, %s1000_s18, %s1000_s18, %s1001_s19  }
 0x140 PF: > { %p804_p2 = scmp.ge.s32.totalorder %s997_s17, 2  ;;  %s598_s21 = sand.u32 1, %s977_s12  }
 0x141   : > { %s599_s26 = scalar_lea.sflag [#allocation3], %s598_s21 }
 0x142   : > { %p801_p3 = pnand %p804_p2, %p1069_p8 }
 0x144   : > { %972 = dma.done.wait (!%p801_p3), %s599_s26, 2048  }
 0x145   : > { %974 = vsyncadd (!%p801_p3), %s599_s26, 4294965248  ;;  %s16_s17 = sadd.s32 1, %s997_s17   ;;  %s1211_s12 = smov %s981_s13 }
 0x146   : > { %p13_p5 = scmp.ge.s32.totalorder %s16_s17, 5   ;;  %s1212_s13 = smov %s985_s14 }
 0x147   : > { %s1213_s14 = smov %s1075_s25  ;;  %s1214_s15 = smov %s993_s16 }
 0x148   : > { %s1215_s16 = smov %s1217_s20  ;;  %15 = sbr.rel (!%p13_p5) target bundleno = 4 (0x4), region = 73 }
 0x14f   :  { %604 = vsyncpa [#allocation3], 1 }
 0x150   :  { %606 = vsyncpa [#allocation3 + $0x1], 1 }

</bundles_post_ra>
